<compile_context>
chip_gen: v7x
topology: tpu7x:2x2x1
jax: 0.10.0
libtpu: 0.0.40
codegen_flags: <defaults>
</compile_context>

<pallas_src>
import jax
import jax.numpy as jnp
from jax.experimental import pallas as pl
from jax.experimental.pallas import tpu as pltpu

IN_DIM = 20
HIDDEN_DIM = 256
OUT_DIM = 10
OUT_PAD = 128            # lane-dense output width (>= OUT_DIM, multiple of 128)
DEFAULT_BLOCK_B = 256    # batch tile; modest so (TB, 256) hidden fits comfortably


def _round_up(x: int, m: int) -> int:
    return ((x + m - 1) // m) * m


def mlp_kernel(x_ref, w1_ref, b1_ref, w2_ref, b2_ref, o_ref, h_ref):
    # First matmul on the MXU: bf16 operands, f32 accumulate.
    x_bf16 = x_ref[...].astype(jnp.bfloat16)                      # (TB, 20)
    h = jnp.dot(x_bf16, w1_ref[...],                              # (TB, 256) f32
                preferred_element_type=jnp.float32)
    # Bias + ReLU in f32 (VPU-safe on v5e as well).
    h = jnp.maximum(h + b1_ref[...], 0.0)
    # Stage the hidden activation in an explicit bf16 VMEM scratch.
    h_ref[...] = h.astype(jnp.bfloat16)
    # Second matmul: bf16 operands, f32 accumulate, lane-dense (TB, 128) output.
    y = jnp.dot(h_ref[...], w2_ref[...],
                preferred_element_type=jnp.float32)
    o_ref[...] = (y + b2_ref[...]).astype(o_ref.dtype)


def mlp_forward(x, w1, b1, w2, b2, *, block_b: int = DEFAULT_BLOCK_B):
    """out = relu(x @ w1 + b1) @ w2 + b2   (f32 in/out, bf16 MXU operands)."""
    B = x.shape[0]

    # Weight prep (done once per call in the wrapper):
    #  - bf16 weights for the MXU (halves VMEM residency / HBM traffic),
    #  - W2/b2 zero-padded to 128 columns for lane-dense stores,
    #  - biases kept f32 for the elementwise path.
    w1_bf16 = w1.astype(jnp.bfloat16)                              # (20, 256)
    b1_f32 = b1.reshape(1, HIDDEN_DIM).astype(jnp.float32)         # (1, 256)
    w2_pad = jnp.zeros((HIDDEN_DIM, OUT_PAD), jnp.bfloat16)
    w2_pad = w2_pad.at[:, :OUT_DIM].set(w2.astype(jnp.bfloat16))   # (256, 128)
    b2_pad = jnp.zeros((1, OUT_PAD), jnp.float32)
    b2_pad = b2_pad.at[:, :OUT_DIM].set(b2.reshape(1, OUT_DIM))    # (1, 128)

    # Batch tiling: tile is a multiple of 8 (sublane), pad ragged batch with zero rows.
    tb = min(block_b, _round_up(B, 8))
    b_pad = _round_up(B, tb)
    if b_pad != B:
        x = jnp.pad(x, ((0, b_pad - B), (0, 0)))
    grid = (pl.cdiv(b_pad, tb),)

    # Rough VMEM budget: double-buffered x/out tiles + resident weights + hidden scratch.
    vmem_bytes = (
        2 * tb * IN_DIM * 4          # x tiles (f32)
        + 2 * tb * OUT_PAD * 4       # out tiles (f32)
        + tb * HIDDEN_DIM * 2        # hidden scratch (bf16)
        + 2 * (IN_DIM * HIDDEN_DIM * 2 + HIDDEN_DIM * 4
               + HIDDEN_DIM * OUT_PAD * 2 + OUT_PAD * 4)  # weights/biases
    )
    vmem_limit = max(2 * vmem_bytes, 4 * 1024 * 1024)

    cost = pl.CostEstimate(
        flops=2 * b_pad * (IN_DIM * HIDDEN_DIM + HIDDEN_DIM * OUT_PAD),
        transcendentals=0,
        bytes_accessed=(b_pad * IN_DIM * 4 + b_pad * OUT_PAD * 4
                        + IN_DIM * HIDDEN_DIM * 2 + HIDDEN_DIM * OUT_PAD * 2
                        + HIDDEN_DIM * 4 + OUT_PAD * 4),
    )

    out_padded = pl.pallas_call(
        mlp_kernel,
        out_shape=jax.ShapeDtypeStruct((b_pad, OUT_PAD), jnp.float32),
        grid_spec=pltpu.PrefetchScalarGridSpec(
            num_scalar_prefetch=0,
            grid=grid,
            in_specs=[
                pl.BlockSpec((tb, IN_DIM), lambda i: (i, 0)),          # x tile
                pl.BlockSpec((IN_DIM, HIDDEN_DIM), lambda i: (0, 0)),  # w1 (resident)
                pl.BlockSpec((1, HIDDEN_DIM), lambda i: (0, 0)),       # b1 (resident)
                pl.BlockSpec((HIDDEN_DIM, OUT_PAD), lambda i: (0, 0)), # w2 padded (resident)
                pl.BlockSpec((1, OUT_PAD), lambda i: (0, 0)),          # b2 padded (resident)
            ],
            out_specs=pl.BlockSpec((tb, OUT_PAD), lambda i: (i, 0)),
            scratch_shapes=[pltpu.VMEM((tb, HIDDEN_DIM), jnp.bfloat16)],
        ),
        compiler_params=pltpu.CompilerParams(
            dimension_semantics=("parallel",),
            vmem_limit_bytes=vmem_limit,
        ),
        cost_estimate=cost,
    )(x, w1_bf16, b1_f32, w2_pad, b2_pad)

    # Strip batch padding and the lane padding of the output.
    return out_padded[:B, :OUT_DIM]


def init_params(key):
    # Deterministic init mimicking nn.Linear's uniform(-1/sqrt(fan_in), 1/sqrt(fan_in)).
    k1, k2, k3, k4 = jax.random.split(key, 4)
    bound1 = 1.0 / jnp.sqrt(IN_DIM)
    bound2 = 1.0 / jnp.sqrt(HIDDEN_DIM)
    w1 = jax.random.uniform(k1, (IN_DIM, HIDDEN_DIM), jnp.float32, -bound1, bound1)
    b1 = jax.random.uniform(k2, (1, HIDDEN_DIM), jnp.float32, -bound1, bound1)
    w2 = jax.random.uniform(k3, (HIDDEN_DIM, OUT_DIM), jnp.float32, -bound2, bound2)
    b2 = jax.random.uniform(k4, (1, OUT_DIM), jnp.float32, -bound2, bound2)
    return w1, b1, w2, b2


if __name__ == "__main__":
    # NOTE: at B=2 this is pure launch/DMA overhead territory; the kernel design only
    # pays off for batch sizes in the hundreds+. Kept at B=2 to match the module spec.
    key = jax.random.PRNGKey(0)
    kx, kp = jax.random.split(key)
    x = jax.random.normal(kx, (2, IN_DIM), dtype=jnp.float32)   # matches X = randn(2, 20)
    w1, b1, w2, b2 = init_params(kp)

    out = mlp_forward(x, w1, b1, w2, b2)
    out = jax.block_until_ready(out)

    # Reference that mirrors the kernel's math exactly (bf16 MXU operands, f32 accumulate).
    h_ref = jnp.dot(x.astype(jnp.bfloat16), w1.astype(jnp.bfloat16),
                    preferred_element_type=jnp.float32)
    h_ref = jnp.maximum(h_ref + b1, 0.0)
    ref_exact = jnp.dot(h_ref.astype(jnp.bfloat16), w2.astype(jnp.bfloat16),
                        preferred_element_type=jnp.float32) + b2

    # Pure-f32 PyTorch-semantics reference (looser tolerance due to bf16 MXU operands).
    ref_f32 = jnp.maximum(x @ w1 + b1, 0.0) @ w2 + b2

    assert out.shape == (2, OUT_DIM)
    assert jnp.allclose(out, ref_exact, atol=1e-4, rtol=1e-4)
    assert jnp.allclose(out, ref_f32, atol=5e-2, rtol=5e-2)
    print("KERNEL_OK")
</pallas_src>

<mosaic_0001>
module attributes {stable_mosaic.version = 11 : i64} {
  func.func @mlp_kernel(%arg0: i32, %arg1: memref<8x20xf32, #tpu.memory_space<vmem>>, %arg2: memref<20x256xbf16, #tpu.memory_space<vmem>>, %arg3: memref<1x256xf32, #tpu.memory_space<vmem>>, %arg4: memref<256x128xbf16, #tpu.memory_space<vmem>>, %arg5: memref<1x128xf32, #tpu.memory_space<vmem>>, %arg6: memref<8x128xf32, #tpu.memory_space<vmem>>, %arg7: memref<8x256xbf16, #tpu.memory_space<vmem>>) attributes {dimension_semantics = [#tpu.dimension_semantics<parallel>], iteration_bounds = array<i64: 1>, scalar_prefetch = 0 : i64, scratch_operands = 1 : i64, tpu.core_type = #tpu.core_type<tc>, window_params = [{transform_indices = @transform_0, window_bounds = array<i64: 8, 20>}, {pipeline_mode = #tpu.pipeline_mode<synchronous>, transform_indices = @transform_1, window_bounds = array<i64: 20, 256>}, {pipeline_mode = #tpu.pipeline_mode<synchronous>, transform_indices = @transform_2, window_bounds = array<i64: 1, 256>}, {pipeline_mode = #tpu.pipeline_mode<synchronous>, transform_indices = @transform_3, window_bounds = array<i64: 256, 128>}, {pipeline_mode = #tpu.pipeline_mode<synchronous>, transform_indices = @transform_4, window_bounds = array<i64: 1, 128>}, {transform_indices = @transform_5, window_bounds = array<i64: 8, 128>}]} {
    %c0 = arith.constant 0 : index
    %c0_0 = arith.constant 0 : index
    %0 = vector.load %arg1[%c0, %c0_0] : memref<8x20xf32, #tpu.memory_space<vmem>>, vector<8x20xf32>
    %1 = arith.truncf %0 : vector<8x20xf32> to vector<8x20xbf16>
    %c0_1 = arith.constant 0 : index
    %c0_2 = arith.constant 0 : index
    %2 = vector.load %arg2[%c0_1, %c0_2] : memref<20x256xbf16, #tpu.memory_space<vmem>>, vector<20x256xbf16>
    %cst = arith.constant dense<0.000000e+00> : vector<8x256xf32>
    %3 = tpu.matmul %1, %2, %cst {dimension_numbers = #tpu.dot_dimension_numbers<[1], [0], [0], [1], [0, 0, 1, 1], [], []>} : vector<8x20xbf16>, vector<20x256xbf16>, vector<8x256xf32> -> vector<8x256xf32>
    %c0_3 = arith.constant 0 : index
    %c0_4 = arith.constant 0 : index
    %4 = vector.load %arg3[%c0_3, %c0_4] : memref<1x256xf32, #tpu.memory_space<vmem>>, vector<1x256xf32>
    %5 = vector.broadcast %4 : vector<1x256xf32> to vector<8x256xf32>
    %6 = arith.addf %3, %5 : vector<8x256xf32>
    %cst_5 = arith.constant 0.000000e+00 : f32
    %7 = vector.broadcast %cst_5 : f32 to vector<8x256xf32>
    %8 = arith.maximumf %6, %7 : vector<8x256xf32>
    %9 = arith.truncf %8 : vector<8x256xf32> to vector<8x256xbf16>
    %c0_6 = arith.constant 0 : index
    %c0_7 = arith.constant 0 : index
    %10 = vector.load %arg7[%c0_6, %c0_7] : memref<8x256xbf16, #tpu.memory_space<vmem>>, vector<8x256xbf16>
    tpu.vector_store %arg7[%c0_6, %c0_7], %9 {strides = array<i32>} : memref<8x256xbf16, #tpu.memory_space<vmem>>, vector<8x256xbf16>,
    %c0_8 = arith.constant 0 : index
    %c0_9 = arith.constant 0 : index
    %11 = vector.load %arg7[%c0_8, %c0_9] : memref<8x256xbf16, #tpu.memory_space<vmem>>, vector<8x256xbf16>
    %c0_10 = arith.constant 0 : index
    %c0_11 = arith.constant 0 : index
    %12 = vector.load %arg4[%c0_10, %c0_11] : memref<256x128xbf16, #tpu.memory_space<vmem>>, vector<256x128xbf16>
    %cst_12 = arith.constant dense<0.000000e+00> : vector<8x128xf32>
    %13 = tpu.matmul %11, %12, %cst_12 {dimension_numbers = #tpu.dot_dimension_numbers<[1], [0], [0], [1], [0, 0, 1, 1], [], []>} : vector<8x256xbf16>, vector<256x128xbf16>, vector<8x128xf32> -> vector<8x128xf32>
    %c0_13 = arith.constant 0 : index
    %c0_14 = arith.constant 0 : index
    %14 = vector.load %arg5[%c0_13, %c0_14] : memref<1x128xf32, #tpu.memory_space<vmem>>, vector<1x128xf32>
    %15 = vector.broadcast %14 : vector<1x128xf32> to vector<8x128xf32>
    %16 = arith.addf %13, %15 : vector<8x128xf32>
    %c0_15 = arith.constant 0 : index
    %c0_16 = arith.constant 0 : index
    %17 = vector.load %arg6[%c0_15, %c0_16] : memref<8x128xf32, #tpu.memory_space<vmem>>, vector<8x128xf32>
    tpu.vector_store %arg6[%c0_15, %c0_16], %16 {strides = array<i32>} : memref<8x128xf32, #tpu.memory_space<vmem>>, vector<8x128xf32>,
    return
  }
  func.func @transform_0(%arg0: i32) -> (i32, i32) {
    %c0_i32 = arith.constant 0 : i32
    %c0_i32_0 = arith.constant 0 : i32
    return %arg0, %c0_i32 : i32, i32
  }
  func.func @transform_1(%arg0: i32) -> (i32, i32) {
    %c0_i32 = arith.constant 0 : i32
    %c0_i32_0 = arith.constant 0 : i32
    %c0_i32_1 = arith.constant 0 : i32
    return %c0_i32, %c0_i32_0 : i32, i32
  }
  func.func @transform_2(%arg0: i32) -> (i32, i32) {
    %c0_i32 = arith.constant 0 : i32
    %c0_i32_0 = arith.constant 0 : i32
    %c0_i32_1 = arith.constant 0 : i32
    return %c0_i32, %c0_i32_0 : i32, i32
  }
  func.func @transform_3(%arg0: i32) -> (i32, i32) {
    %c0_i32 = arith.constant 0 : i32
    %c0_i32_0 = arith.constant 0 : i32
    %c0_i32_1 = arith.constant 0 : i32
    return %c0_i32, %c0_i32_0 : i32, i32
  }
  func.func @transform_4(%arg0: i32) -> (i32, i32) {
    %c0_i32 = arith.constant 0 : i32
    %c0_i32_0 = arith.constant 0 : i32
    %c0_i32_1 = arith.constant 0 : i32
    return %c0_i32, %c0_i32_0 : i32, i32
  }
  func.func @transform_5(%arg0: i32) -> (i32, i32) {
    %c0_i32 = arith.constant 0 : i32
    %c0_i32_0 = arith.constant 0 : i32
    return %arg0, %c0_i32 : i32, i32
  }
}

</mosaic_0001>

<bundles_post_ra>
// kernel: tpu_custom_call.1
= control target key start
LH: loop header
LB: loop body
LE: loop exit
PB: predicated region body
PF: predicated region fallthrough
CT: control target
= control target key end

     0   :  { %10 = vsyncpa [#allocation4], 0  ;;  %s624_s0 = inlined_call_operand.hbm [shape: f32[8,20], index: 0, kind: input, shape index: {}]   ;;  %s625_s1 = inlined_call_operand.hbm [shape: bf16[20,256], index: 1, kind: input, shape index: {}]   ;;  %s626_s2 = inlined_call_operand.vmem [shape: f32[1,256], index: 2, kind: input, shape index: {}]   ;;  %s627_s3 = inlined_call_operand.hbm [shape: bf16[256,128], index: 3, kind: input, shape index: {}]   ;;  %s628_s4 = inlined_call_operand.vmem [shape: f32[1,128], index: 4, kind: input, shape index: {}]   ;;  %s629_s5 = inlined_call_operand.hbm [shape: f32[8,128], index: 5, kind: output, shape index: {}]  }
   0x1   :  { %11 = vsyncpa [#allocation7], 0 }
   0x2   :  { %12 = vsyncpa [#allocation5], 0  ;;  %s531_s18 = smov [#allocation6]   ;;  %s437_s22 = scalar_lea.hbm %s625_s1, 384 }
   0x3   :  { %s28_s19 = sshll.u32 %s531_s18, 4  ;;  %p438_p0 = scmp.ne.s32.totalorder %s625_s1, %s437_s22  ;;  %s29_s19 = int_to_ptr.vmem [resolvable:$true] %s28_s19 }
   0x4   :  { %p441_p1 = scmp.lt.u32.totalorder %s437_s22, %s625_s1 }
   0x6   :  { %p443_p2 = pnand %p441_p1, %p438_p0 }
   0x8   :  { %446 = shalt.err (!%p443_p2)
}
   0x9   :  { %s447_s27 = scalar_lea.vmem %s29_s19, 384  ;;  %p452_p4 = scmp.lt.s32.totalorder %s29_s19, %s29_s19 }
   0xa   :  { %p448_p3 = scmp.ne.s32.totalorder %s29_s19, %s447_s27  ;;  %p453_p5 = scmp.lt.s32.totalorder %s447_s27, %s447_s27 }
   0xc   :  { %p454_p6 = por %p453_p5, %p452_p4 }
   0xe   :  { %p455_p7 = pnand %p454_p6, %p448_p3 }
  0x10   :  { %458 = shalt.err (!%p455_p7)
}
  0x11   :  { %s532_s28 = smov 128   ;;  %s533_s29 = smov 8  }
  0x12   :  { %34 = dma.hbm_to_vmem [thread:$0]  %s625_s1, 384, %s29_s19, [#allocation7], %s532_s28, %s532_s28, %s533_s29  }
  0x13   :  { %s534_s7 = smov [#allocation3]   ;;  %s535_s9 = smov [#allocation8]  }
  0x14   :  { %s19_s8 = sshll.u32 %s534_s7, 4  ;;  %s42_s10 = sshll.u32 %s535_s9, 4  ;;  %s20_s8 = int_to_ptr.vmem [resolvable:$true] %s19_s8  ;;  %s43_s10 = int_to_ptr.vmem [resolvable:$true] %s42_s10 }
  0x15   :  { %s459_s13 = scalar_lea.hbm %s624_s0, 128 }
  0x16   :  { %p460_p8 = scmp.ne.s32.totalorder %s624_s0, %s459_s13  ;;  %p463_p9 = scmp.lt.u32.totalorder %s459_s13, %s624_s0 }
  0x18   :  { %p465_p10 = pnand %p463_p9, %p460_p8 }
  0x1a   :  { %468 = shalt.err (!%p465_p10)
}
  0x1b   :  { %s469_s1 = scalar_lea.vmem %s20_s8, 128  ;;  %p474_p12 = scmp.lt.s32.totalorder %s20_s8, %s20_s8 }
  0x1c   :  { %p470_p11 = scmp.ne.s32.totalorder %s20_s8, %s469_s1  ;;  %p475_p13 = scmp.lt.s32.totalorder %s469_s1, %s469_s1 }
  0x1e   :  { %p476_p0 = por %p475_p13, %p474_p12 }
  0x20   :  { %p477_p1 = pnand %p476_p0, %p470_p11 }
  0x22   :  { %480 = shalt.err (!%p477_p1)
}
  0x23   :  { %22 = dma.hbm_to_vmem [thread:$0]  %s624_s0, 128, %s20_s8, [#allocation4]  }
  0x24   :  { %s481_s22 = scalar_lea.hbm %s627_s3, 2048 }
  0x25   :  { %p482_p2 = scmp.ne.s32.totalorder %s627_s3, %s481_s22  ;;  %p485_p3 = scmp.lt.u32.totalorder %s481_s22, %s627_s3 }
  0x27   :  { %p487_p4 = pnand %p485_p3, %p482_p2 }
  0x29   :  { %490 = shalt.err (!%p487_p4)
}
  0x2a   :  { %s491_s27 = scalar_lea.vmem %s43_s10, 2048  ;;  %p496_p6 = scmp.lt.s32.totalorder %s43_s10, %s43_s10 }
  0x2b   :  { %p492_p5 = scmp.ne.s32.totalorder %s43_s10, %s491_s27  ;;  %p497_p7 = scmp.lt.s32.totalorder %s491_s27, %s491_s27 }
  0x2d   :  { %p498_p8 = por %p497_p7, %p496_p6 }
  0x2f   :  { %p499_p9 = pnand %p498_p8, %p492_p5 }
  0x31   :  { %502 = shalt.err (!%p499_p9)
}
  0x32   :  { %s536_s0 = smov 64   ;;  %s537_s28 = smov 4  }
  0x33   :  { %48 = dma.hbm_to_vmem [thread:$0]  %s627_s3, 2048, %s43_s10, [#allocation7], %s536_s0, %s536_s0, %s537_s28  }
  0x34   :  { %525 = dma.done.wait [#allocation4], 128  }
  0x35   :  { %526 = vsyncadd [#allocation4], 4294967168 }
  0x36   :  { %527 = dma.done.wait [#allocation7], 2432  }
  0x37   :  { %528 = vsyncadd [#allocation7], 4294964864  ;;  %v538_v0 = vmov 0   ;;  %v416_v1 = vld [vmem:[#allocation6 + $0x4] ss:$8 sps:$4 sm:$0xff]   ;;  %vm97_vm0 = vcmask 1041408   ;;  %v68_v25 = vlaneseq }
  0x38   :  { %136 = vmatprep.mubr.bf16.mxu0 %v538_v0  ;;  %v418_v2 = vld [vmem:[#allocation6] ss:$8 sps:$4 sm:$0xff]   ;;  %v65_v3 = vld [vmem:[#allocation6 + $0x10] sm:$0x33]  ;;  %v61_v4 = vld [vmem:[#allocation3] sm:$0xff]  ;;  %104 = vmatprep.subr.bf16.mxu0 %v416_v1  ;;  %vm93_vm1 = vcmask 162816  }
  0x39   :  { %v359_v5 = vcombine.high %v65_v3, %v65_v3  ;;  %v358_v6 = vcombine.low %v65_v3, %v65_v3  ;;  %v421_v7 = vld [vmem:[#allocation8 + $0x40] sm:$0xff]   ;;  %105 = vmatpush1.bf16.msra.mxu0 %v418_v2  ;;  %v423_v10 = vld [vmem:[#allocation8 + $0x48] sm:$0xff]   ;;  %v62_v12 = vpack.c.bf16 %v61_v4, %v61_v4  ;;  %v425_v13 = vld [vmem:[#allocation8 + $0x50] sm:$0xff]   ;;  %v69_v26 = vshrl.u32 %v68_v25, 7 }
  0x3a   :  { %v422_v8 = vld [vmem:[#allocation8] sm:$0xff]   ;;  %385 = vmatprep.subr.bf16.mxu1 %v421_v7  ;;  %v424_v11 = vld [vmem:[#allocation8 + $0x8] sm:$0xff]   ;;  %v426_v14 = vld [vmem:[#allocation8 + $0x10] sm:$0xff]  }
  0x3b   :  { %360 = vmatprep.subr.msk.bf16.mxu0 %vm97_vm0, %v359_v5  ;;  %v99_v9 = vsel %vm97_vm0, %v358_v6, 0  ;;  %386 = vmatpush3.bf16.msra.mxu1 %v422_v8  ;;  %v427_v15 = vld [vmem:[#allocation8 + $0x58] sm:$0xff]   ;;  %v429_v17 = vld [vmem:[#allocation8 + $0x60] sm:$0xff]   ;;  %v431_v19 = vld [vmem:[#allocation8 + $0x68] sm:$0xff]   ;;  %v70_v27 = vsub.s32 0, %v69_v26  ;;  %v74_v29 = vsub.s32 1, %v69_v26 }
  0x3c   :  { %387 = vmatprep.subr.bf16.mxu1 %v423_v10  ;;  %v428_v16 = vld [vmem:[#allocation8 + $0x18] sm:$0xff]   ;;  %v430_v18 = vld [vmem:[#allocation8 + $0x20] sm:$0xff]   ;;  %v432_v20 = vld [vmem:[#allocation8 + $0x28] sm:$0xff]  }
  0x3d   :  { %107 = vmatpush1.bf16.msra.mxu0 %v99_v9  ;;  %v433_v21 = vld [vmem:[#allocation8 + $0x70] sm:$0xff]   ;;  %v435_v23 = vld [vmem:[#allocation8 + $0x78] sm:$0xff]   ;;  %v66_v28 = vld [vmem:[%s626_s2] sm:$0x3]  ;;  %s539_s2 = smov [#allocation9]  }
  0x3e   :  { %v434_v22 = vld [vmem:[#allocation8 + $0x30] sm:$0xff]   ;;  %v436_v24 = vld [vmem:[#allocation8 + $0x38] sm:$0xff]   ;;  %v71_v30 = vrot.slane %v66_v28, %v70_v27  ;;  %v75_v31 = vrot.slane %v66_v28, %v74_v29  ;;  %v363_v43 = vld [vmem:[%s628_s4] ss:$0 sm:$0xff]  ;;  %s346_s9 = sshll.u32 %s539_s2, 4  ;;  %s347_s9 = int_to_ptr.vmem [resolvable:$true] %s346_s9 }
  0x3f   :  { %388 = vmatpush3.bf16.msra.mxu1 %v424_v11  ;;  %s503_s10 = scalar_lea.vmem %s347_s9, 128  ;;  %p508_p11 = scmp.lt.s32.totalorder %s347_s9, %s347_s9 }
  0x40   :  { %361 = vmatmul.mubr.msk.bf16.vlgmr.msra.gmra.mrb[0].mxu0 %vm93_vm1, %v62_v12  ;;  %389 = vmatprep.subr.bf16.mxu1 %v425_v13  ;;  %p504_p10 = scmp.ne.s32.totalorder %s347_s9, %s503_s10  ;;  %p509_p12 = scmp.lt.s32.totalorder %s503_s10, %s503_s10 }
  0x42   :  { %p510_p13 = por %p509_p12, %p508_p11 }
  0x43   :  { %390 = vmatpush3.bf16.msra.mxu1 %v426_v14 }
  0x44   :  { %391 = vmatprep.subr.bf16.mxu1 %v427_v15  ;;  %p511_p0 = pnand %p510_p13, %p504_p10 }
  0x47   :  { %392 = vmatpush3.bf16.msra.mxu1 %v428_v16 }
  0x48   :  { %393 = vmatprep.subr.bf16.mxu1 %v429_v17 }
  0x4b   :  { %394 = vmatpush3.bf16.msra.mxu1 %v430_v18 }
  0x4c   :  { %395 = vmatprep.subr.bf16.mxu1 %v431_v19 }
  0x4f   :  { %396 = vmatpush3.bf16.msra.mxu1 %v432_v20 }
  0x50   :  { %397 = vmatprep.subr.bf16.mxu1 %v433_v21 }
  0x53   :  { %398 = vmatpush3.bf16.msra.mxu1 %v434_v22 }
  0x54   :  { %399 = vmatprep.subr.bf16.mxu1 %v435_v23 }
  0x57   :  { %400 = vmatpush3.bf16.msra.mxu1 %v436_v24 }
 0x113   :  { %v138_v32 = vpop.f32.mrb[0].mxu0 }
 0x114   :  { %v139_v33 = vadd.f32 %v138_v32, %v71_v30  ;;  %v140_v34 = vpop.f32.mrb[1].mxu0 }
 0x115   :  { %v141_v35 = vadd.f32 %v140_v34, %v75_v31  ;;  %v142_v36 = vpop.f32.mrb[2].mxu0 }
 0x116   :  { %v145_v37 = vmax.f32 %v139_v33, 0.0  ;;  %v143_v38 = vpop.f32.mrb[3].mxu0 }
 0x117   :  { %v146_v39 = vmax.f32 %v141_v35, 0.0 }
 0x118   :  { %v383_v41 = vpack.c.bf16 %v145_v37, %v145_v37 }
 0x119   :  { %v384_v40 = vpack.c.bf16 %v146_v39, %v146_v39 }
 0x11b   :  { %331 = vmatprep.mubr.bf16.mxu1 %v384_v40 }
 0x11c   :  { %332 = vmatmul.mubr.bf16.vlgmr.msra.gmra.mrb[0].mxu1 %v383_v41 }
 0x1ef   :  { %v401_v42 = vpop.f32.mrb[0].mxu1 }
 0x1f0   :  { %v402_v44 = vpop.f32.mrb[1].mxu1 }
 0x1f1   :  { %v403_v45 = vadd.f32 %v402_v44, %v401_v42  ;;  %v404_v46 = vpop.f32.mrb[2].mxu1 }
 0x1f2   :  { %v405_v47 = vpop.f32.mrb[3].mxu1 }
 0x1f3   :  { %v334_v48 = vadd.f32 %v403_v45, %v363_v43 }
 0x1f5   :  { %339 = vst [vmem:[#allocation9] sm:$0xff] %v334_v48 }
 0x1f6   :  { %514 = shalt.err (!%p511_p0)
}
 0x1f7   :  { %s515_s4 = scalar_lea.hbm %s629_s5, 128 }
 0x1f8   :  { %p516_p1 = scmp.ne.s32.totalorder %s629_s5, %s515_s4  ;;  %p519_p2 = scmp.lt.u32.totalorder %s515_s4, %s629_s5 }
 0x1fa   :  { %p521_p3 = pnand %p519_p2, %p516_p1 }
 0x1fc   :  { %524 = shalt.err (!%p521_p3)
}
 0x1fd   :  { %349 = dma.vmem_to_hbm [thread:$0]  %s347_s9, 128, %s629_s5, [#allocation5]  }
 0x1fe   :  { %529 = dma.done.wait [#allocation5], 128  }
 0x1ff   :  { %530 = vsyncadd [#allocation5], 4294967168 }
 0x200   :  { %353 = vsyncpa [#allocation4], 1 }
 0x201   :  { %354 = vsyncpa [#allocation7], 1 }
 0x202   :  { %355 = vsyncpa [#allocation5], 1 }

</bundles_post_ra>
